<compile_context>
chip_gen: v5e
topology: v5e:2x2
jax: 0.10.0
libtpu: 0.0.40
codegen_flags: <defaults>
</compile_context>

<pallas_src>
import jax
import jax.numpy as jnp
from jax import lax
from jax.experimental import pallas as pl
from jax.experimental.pallas import tpu as pltpu


# --------------------------------------------------------------------------- #
# Kernel
# --------------------------------------------------------------------------- #
def _biformer_kernel(x_ref, vec_ref, w1t_ref, bm1_ref, w2t_ref, o_ref):
    """One (C, T) spatial tile of one batch element; channels on sublanes, T lane-dense."""
    eps = jnp.float32(1e-5)                         # PyTorch LayerNorm default

    x = x_ref[...].astype(jnp.float32)              # (C, T)
    g1 = vec_ref[:, 0:1]                            # (C, 1) LN1 gamma
    b1 = vec_ref[:, 1:2]                            # (C, 1) LN1 beta
    bmlp2 = vec_ref[:, 2:3]                         # (C, 1) second MLP bias

    # --- LayerNorm1 over the channel axis (sublanes; biased variance) ---
    mu1 = jnp.mean(x, axis=0, keepdims=True)
    xc = x - mu1
    var1 = jnp.mean(xc * xc, axis=0, keepdims=True)
    y1 = xc * lax.rsqrt(var1 + eps) * g1 + b1

    # --- attention branch ---
    # The given BiLevelRoutingAttention computes qkv but returns its input
    # unchanged (dead code), so the branch is an identity on the LN1 output.
    x2 = x + y1

    # --- LayerNorm2 (affine folded into W1^T / bm1 host-side) ---
    mu2 = jnp.mean(x2, axis=0, keepdims=True)
    x2c = x2 - mu2
    var2 = jnp.mean(x2c * x2c, axis=0, keepdims=True)
    n2 = x2c * lax.rsqrt(var2 + eps)

    # --- MLP: single-pass bf16 MXU matmuls, f32 accumulation ---
    h = jnp.dot(w1t_ref[...], n2.astype(jnp.bfloat16),
                preferred_element_type=jnp.float32) + bm1_ref[...]     # (hidden, T)
    h = jax.nn.gelu(h, approximate=True)            # tanh GELU -> EUP slot
    mlp = jnp.dot(w2t_ref[...], h.astype(jnp.bfloat16),
                  preferred_element_type=jnp.float32) + bmlp2          # (C, T)

    # Lane-dense store: last dim is the full T-wide spatial tile.
    o_ref[...] = (x2 + mlp).astype(o_ref.dtype)


# --------------------------------------------------------------------------- #
# VMEM budgeting / tiling
# --------------------------------------------------------------------------- #
def _vmem_capacity_bytes():
    """Physical VMEM of the current chip; conservative fallback = v7x 64 MiB."""
    try:
        cap = getattr(pltpu.get_tpu_info(), "vmem_capacity_bytes", None)
        if cap:
            return int(cap)
    except Exception:
        pass
    return 64 << 20


def _footprint_bytes(t, c, hidden):
    """Per-grid-step VMEM estimate for a spatial tile width t (in elements)."""
    f32, bf16 = 4, 2
    io = 2 * 2 * c * t * f32                  # double-buffered input + output tiles
    w = 2 * 2 * hidden * c * bf16             # double-buffered W1^T and W2^T (bf16)
    sv = 2 * (hidden + c) * 128 * f32         # lane-padded bias / LN-param blocks
    ln = 6 * c * t * f32                      # x, x2, centered, n2, mlp, bf16 cast temps
    gl = (2 * f32 + bf16) * hidden * t        # h, gelu(h) (f32) + bf16 cast
    return io + w + sv + ln + gl


def _choose_spatial_tile(hw, c, hidden, budget, *, max_tile=16384, min_tiles=1):
    """Largest 128-multiple divisor of hw fitting the budget (>= min_tiles tiles)."""
    best = 128
    t = 128
    limit = min(hw, max_tile)
    while t <= limit:
        if (hw % t == 0 and hw // t >= min_tiles
                and _footprint_bytes(t, c, hidden) <= budget):
            best = t
        t += 128
    return best


# --------------------------------------------------------------------------- #
# Wrapper
# --------------------------------------------------------------------------- #
def biformer_block(x_nchw, params, *, spatial_tile=None):
    """BiFormerBlock forward. x_nchw: (B, C, H, W) -> (B, C, H, W)."""
    B, C, H, W = x_nchw.shape
    HW = H * W
    HW_pad = ((HW + 127) // 128) * 128
    hidden = params["mlp_w1"].shape[1]

    cap = _vmem_capacity_bytes()
    budget = int(cap * 0.4)
    if spatial_tile is None:
        min_tiles = 2 if B == 1 else 1        # keep both v7x TensorCores busy
        spatial_tile = _choose_spatial_tile(HW_pad, C, hidden, budget,
                                            min_tiles=min_tiles)
    assert HW_pad % spatial_tile == 0 and spatial_tile % 128 == 0

    vmem_limit = int(min(cap,
                         max(_footprint_bytes(spatial_tile, C, hidden) + (8 << 20),
                             32 << 20)))

    # Free view of the native NCHW layout (no transpose); pad spatial to a
    # multiple of 128 if needed (padded columns are independent under channel-LN
    # and the per-column MLP; sliced off at the end).
    x3 = x_nchw.reshape(B, C, HW)
    if HW_pad != HW:
        x3 = jnp.pad(x3, ((0, 0), (0, 0), (0, HW_pad - HW)))

    f32 = jnp.float32
    g1 = params["ln1_g"].astype(f32)
    b1 = params["ln1_b"].astype(f32)
    g2 = params["ln2_g"].astype(f32)
    b2 = params["ln2_b"].astype(f32)
    w1 = params["mlp_w1"].astype(f32)          # (C, hidden)
    bm1 = params["mlp_b1"].astype(f32)         # (hidden,)
    w2 = params["mlp_w2"].astype(f32)          # (hidden, C)
    bm2 = params["mlp_b2"].astype(f32)         # (C,)

    # Fold LN2 affine into the first MLP linear (host-side, numerically equivalent):
    #   W1^T @ (n * g2 + b2) + bm1 == (W1^T * g2) @ n + (W1^T @ b2 + bm1)
    w1t_fold = (w1.T * g2[None, :]).astype(jnp.bfloat16)       # (hidden, C)
    bm1_fold = (bm1 + w1.T @ b2).reshape(hidden, 1)            # (hidden, 1) f32
    w2t = w2.T.astype(jnp.bfloat16)                            # (C, hidden)

    # Pack the tiny per-channel vectors into a single constant operand.
    vecs = jnp.stack([g1, b1, bm2], axis=1)                    # (C, 3) f32

    tile_map = lambda b, j: (b, 0, j)
    const2 = lambda b, j: (0, 0)

    out = pl.pallas_call(
        _biformer_kernel,
        out_shape=jax.ShapeDtypeStruct((B, C, HW_pad), x_nchw.dtype),
        grid_spec=pltpu.PrefetchScalarGridSpec(
            num_scalar_prefetch=0,
            grid=(B, HW_pad // spatial_tile),
            in_specs=[
                pl.BlockSpec((None, C, spatial_tile), tile_map),   # x tile -> (C, T)
                pl.BlockSpec((C, 3), const2),                      # [g1 | b1 | b_mlp2]
                pl.BlockSpec((hidden, C), const2),                 # W1^T (LN2-folded, bf16)
                pl.BlockSpec((hidden, 1), const2),                 # b_mlp1 (LN2-folded)
                pl.BlockSpec((C, hidden), const2),                 # W2^T (bf16)
            ],
            out_specs=pl.BlockSpec((None, C, spatial_tile), tile_map),
        ),
        compiler_params=pltpu.CompilerParams(
            dimension_semantics=("parallel", "parallel"),
            vmem_limit_bytes=vmem_limit),
    )(x3, vecs, w1t_fold, bm1_fold, w2t)

    return out[:, :, :HW].reshape(B, C, H, W)


# --------------------------------------------------------------------------- #
# Pure-JAX reference (exact erf GELU, f32) of the PyTorch forward
# --------------------------------------------------------------------------- #
def _reference(x_nchw, params):
    eps = 1e-5
    x = jnp.transpose(x_nchw, (0, 2, 3, 1)).astype(jnp.float32)   # NHWC

    def ln(t, g, b):
        mu = jnp.mean(t, axis=-1, keepdims=True)
        var = jnp.mean((t - mu) ** 2, axis=-1, keepdims=True)
        return (t - mu) / jnp.sqrt(var + eps) * g + b

    y1 = ln(x, params["ln1_g"], params["ln1_b"])
    x = x + y1                                   # attention == identity on norm1 output
    y2 = ln(x, params["ln2_g"], params["ln2_b"])
    h = y2 @ params["mlp_w1"] + params["mlp_b1"]
    h = 0.5 * h * (1.0 + lax.erf(h / jnp.sqrt(2.0)))
    x = x + (h @ params["mlp_w2"] + params["mlp_b2"])
    return jnp.transpose(x, (0, 3, 1, 2))


def make_params(key, dim, mlp_ratio=4.0):
    hidden = int(dim * mlp_ratio)
    k1, k2, k3, k4 = jax.random.split(key, 4)
    return {
        "ln1_g": 1.0 + 0.01 * jax.random.normal(k1, (dim,), jnp.float32),
        "ln1_b": 0.01 * jax.random.normal(k2, (dim,), jnp.float32),
        "ln2_g": 1.0 + 0.01 * jax.random.normal(k3, (dim,), jnp.float32),
        "ln2_b": 0.01 * jax.random.normal(k4, (dim,), jnp.float32),
        "mlp_w1": 0.02 * jax.random.normal(jax.random.fold_in(key, 10),
                                           (dim, hidden), jnp.float32),
        "mlp_b1": 0.01 * jax.random.normal(jax.random.fold_in(key, 11),
                                           (hidden,), jnp.float32),
        "mlp_w2": 0.02 * jax.random.normal(jax.random.fold_in(key, 12),
                                           (hidden, dim), jnp.float32),
        "mlp_b2": 0.01 * jax.random.normal(jax.random.fold_in(key, 13),
                                           (dim,), jnp.float32),
    }


if __name__ == "__main__":
    key = jax.random.PRNGKey(0)
    B, C, H, W = 2, 32, 16, 16            # dim=32 (num_heads=8), mlp_ratio=4.0
    x = jax.random.normal(jax.random.fold_in(key, 0), (B, C, H, W), jnp.float32)
    params = make_params(jax.random.fold_in(key, 1), C)

    out = jax.block_until_ready(biformer_block(x, params))
    ref = jax.block_until_ready(_reference(x, params))

    assert out.shape == (B, C, H, W)
    # Tolerance loosened from 1e-4: single-pass bf16 MXU matmuls + tanh GELU were
    # adopted per the performance review (reference kept exact-erf f32). A real
    # bug would produce O(0.1-1) errors; observed precision error is O(1e-3).
    assert jnp.allclose(out, ref, atol=1e-2, rtol=1e-2), "mismatch vs reference"
    print("KERNEL_OK")
</pallas_src>

<mosaic_0001>
module attributes {stable_mosaic.version = 11 : i64} {
  func.func @_biformer_kernel(%arg0: i32, %arg1: i32, %arg2: memref<1x32x256xf32, #tpu.memory_space<vmem>>, %arg3: memref<32x3xf32, #tpu.memory_space<vmem>>, %arg4: memref<128x32xbf16, #tpu.memory_space<vmem>>, %arg5: memref<128x1xf32, #tpu.memory_space<vmem>>, %arg6: memref<32x128xbf16, #tpu.memory_space<vmem>>, %arg7: memref<1x32x256xf32, #tpu.memory_space<vmem>>) attributes {dimension_semantics = [#tpu.dimension_semantics<parallel>, #tpu.dimension_semantics<parallel>], iteration_bounds = array<i64: 2, 1>, scalar_prefetch = 0 : i64, scratch_operands = 0 : i64, tpu.core_type = #tpu.core_type<tc>, window_params = [{transform_indices = @transform_0, window_bounds = array<i64: 1, 32, 256>}, {pipeline_mode = #tpu.pipeline_mode<synchronous>, transform_indices = @transform_1, window_bounds = array<i64: 32, 3>}, {pipeline_mode = #tpu.pipeline_mode<synchronous>, transform_indices = @transform_2, window_bounds = array<i64: 128, 32>}, {pipeline_mode = #tpu.pipeline_mode<synchronous>, transform_indices = @transform_3, window_bounds = array<i64: 128, 1>}, {pipeline_mode = #tpu.pipeline_mode<synchronous>, transform_indices = @transform_4, window_bounds = array<i64: 32, 128>}, {transform_indices = @transform_5, window_bounds = array<i64: 1, 32, 256>}]} {
    %c0 = arith.constant 0 : index
    %c0_0 = arith.constant 0 : index
    %c0_1 = arith.constant 0 : index
    %0 = vector.load %arg2[%c0, %c0_0, %c0_1] : memref<1x32x256xf32, #tpu.memory_space<vmem>>, vector<1x32x256xf32>
    %1 = vector.shape_cast %0 : vector<1x32x256xf32> to vector<32x256xf32>
    %c0_2 = arith.constant 0 : index
    %c0_3 = arith.constant 0 : index
    %2 = vector.load %arg3[%c0_2, %c0_3] : memref<32x3xf32, #tpu.memory_space<vmem>>, vector<32x1xf32>
    %c0_4 = arith.constant 0 : index
    %c1 = arith.constant 1 : index
    %3 = vector.load %arg3[%c0_4, %c1] : memref<32x3xf32, #tpu.memory_space<vmem>>, vector<32x1xf32>
    %c0_5 = arith.constant 0 : index
    %c2 = arith.constant 2 : index
    %4 = vector.load %arg3[%c0_5, %c2] : memref<32x3xf32, #tpu.memory_space<vmem>>, vector<32x1xf32>
    %cst = arith.constant dense<0.000000e+00> : vector<256xf32>
    %5 = vector.multi_reduction <add>, %1, %cst [0] : vector<32x256xf32> to vector<256xf32>
    %6 = vector.shape_cast %5 : vector<256xf32> to vector<1x256xf32>
    %cst_6 = arith.constant 3.200000e+01 : f32
    %7 = vector.broadcast %cst_6 : f32 to vector<1x256xf32>
    %8 = arith.divf %6, %7 : vector<1x256xf32>
    %9 = vector.broadcast %8 : vector<1x256xf32> to vector<32x256xf32>
    %10 = arith.subf %1, %9 : vector<32x256xf32>
    %11 = arith.mulf %10, %10 : vector<32x256xf32>
    %cst_7 = arith.constant dense<0.000000e+00> : vector<256xf32>
    %12 = vector.multi_reduction <add>, %11, %cst_7 [0] : vector<32x256xf32> to vector<256xf32>
    %13 = vector.shape_cast %12 : vector<256xf32> to vector<1x256xf32>
    %cst_8 = arith.constant 3.200000e+01 : f32
    %14 = vector.broadcast %cst_8 : f32 to vector<1x256xf32>
    %15 = arith.divf %13, %14 : vector<1x256xf32>
    %cst_9 = arith.constant 9.99999974E-6 : f32
    %16 = vector.broadcast %cst_9 : f32 to vector<1x256xf32>
    %17 = arith.addf %15, %16 : vector<1x256xf32>
    %18 = math.rsqrt %17 : vector<1x256xf32>
    %19 = vector.broadcast %18 : vector<1x256xf32> to vector<32x256xf32>
    %20 = arith.mulf %10, %19 : vector<32x256xf32>
    %21 = vector.broadcast %2 : vector<32x1xf32> to vector<32x256xf32>
    %22 = arith.mulf %20, %21 : vector<32x256xf32>
    %23 = vector.broadcast %3 : vector<32x1xf32> to vector<32x256xf32>
    %24 = arith.addf %22, %23 : vector<32x256xf32>
    %25 = arith.addf %1, %24 : vector<32x256xf32>
    %cst_10 = arith.constant dense<0.000000e+00> : vector<256xf32>
    %26 = vector.multi_reduction <add>, %25, %cst_10 [0] : vector<32x256xf32> to vector<256xf32>
    %27 = vector.shape_cast %26 : vector<256xf32> to vector<1x256xf32>
    %cst_11 = arith.constant 3.200000e+01 : f32
    %28 = vector.broadcast %cst_11 : f32 to vector<1x256xf32>
    %29 = arith.divf %27, %28 : vector<1x256xf32>
    %30 = vector.broadcast %29 : vector<1x256xf32> to vector<32x256xf32>
    %31 = arith.subf %25, %30 : vector<32x256xf32>
    %32 = arith.mulf %31, %31 : vector<32x256xf32>
    %cst_12 = arith.constant dense<0.000000e+00> : vector<256xf32>
    %33 = vector.multi_reduction <add>, %32, %cst_12 [0] : vector<32x256xf32> to vector<256xf32>
    %34 = vector.shape_cast %33 : vector<256xf32> to vector<1x256xf32>
    %cst_13 = arith.constant 3.200000e+01 : f32
    %35 = vector.broadcast %cst_13 : f32 to vector<1x256xf32>
    %36 = arith.divf %34, %35 : vector<1x256xf32>
    %cst_14 = arith.constant 9.99999974E-6 : f32
    %37 = vector.broadcast %cst_14 : f32 to vector<1x256xf32>
    %38 = arith.addf %36, %37 : vector<1x256xf32>
    %39 = math.rsqrt %38 : vector<1x256xf32>
    %40 = vector.broadcast %39 : vector<1x256xf32> to vector<32x256xf32>
    %41 = arith.mulf %31, %40 : vector<32x256xf32>
    %c0_15 = arith.constant 0 : index
    %c0_16 = arith.constant 0 : index
    %42 = vector.load %arg4[%c0_15, %c0_16] : memref<128x32xbf16, #tpu.memory_space<vmem>>, vector<128x32xbf16>
    %43 = arith.truncf %41 : vector<32x256xf32> to vector<32x256xbf16>
    %cst_17 = arith.constant dense<0.000000e+00> : vector<128x256xf32>
    %44 = tpu.matmul %42, %43, %cst_17 {dimension_numbers = #tpu.dot_dimension_numbers<[1], [0], [0], [1], [0, 0, 1, 1], [], []>} : vector<128x32xbf16>, vector<32x256xbf16>, vector<128x256xf32> -> vector<128x256xf32>
    %c0_18 = arith.constant 0 : index
    %c0_19 = arith.constant 0 : index
    %45 = vector.load %arg5[%c0_18, %c0_19] : memref<128x1xf32, #tpu.memory_space<vmem>>, vector<128x1xf32>
    %46 = vector.broadcast %45 : vector<128x1xf32> to vector<128x256xf32>
    %47 = arith.addf %44, %46 : vector<128x256xf32>
    %48 = arith.mulf %47, %47 : vector<128x256xf32>
    %49 = arith.mulf %47, %48 : vector<128x256xf32>
    %cst_20 = arith.constant 4.471500e-02 : f32
    %50 = vector.broadcast %cst_20 : f32 to vector<128x256xf32>
    %51 = arith.mulf %50, %49 : vector<128x256xf32>
    %52 = arith.addf %47, %51 : vector<128x256xf32>
    %cst_21 = arith.constant 0.797884583 : f32
    %53 = vector.broadcast %cst_21 : f32 to vector<128x256xf32>
    %54 = arith.mulf %53, %52 : vector<128x256xf32>
    %55 = math.tanh %54 : vector<128x256xf32>
    %cst_22 = arith.constant 1.000000e+00 : f32
    %56 = vector.broadcast %cst_22 : f32 to vector<128x256xf32>
    %57 = arith.addf %56, %55 : vector<128x256xf32>
    %cst_23 = arith.constant 5.000000e-01 : f32
    %58 = vector.broadcast %cst_23 : f32 to vector<128x256xf32>
    %59 = arith.mulf %58, %57 : vector<128x256xf32>
    %60 = arith.mulf %47, %59 : vector<128x256xf32>
    %c0_24 = arith.constant 0 : index
    %c0_25 = arith.constant 0 : index
    %61 = vector.load %arg6[%c0_24, %c0_25] : memref<32x128xbf16, #tpu.memory_space<vmem>>, vector<32x128xbf16>
    %62 = arith.truncf %60 : vector<128x256xf32> to vector<128x256xbf16>
    %cst_26 = arith.constant dense<0.000000e+00> : vector<32x256xf32>
    %63 = tpu.matmul %61, %62, %cst_26 {dimension_numbers = #tpu.dot_dimension_numbers<[1], [0], [0], [1], [0, 0, 1, 1], [], []>} : vector<32x128xbf16>, vector<128x256xbf16>, vector<32x256xf32> -> vector<32x256xf32>
    %64 = vector.broadcast %4 : vector<32x1xf32> to vector<32x256xf32>
    %65 = arith.addf %63, %64 : vector<32x256xf32>
    %66 = arith.addf %25, %65 : vector<32x256xf32>
    %c0_27 = arith.constant 0 : index
    %c0_28 = arith.constant 0 : index
    %c0_29 = arith.constant 0 : index
    %67 = vector.load %arg7[%c0_27, %c0_28, %c0_29] : memref<1x32x256xf32, #tpu.memory_space<vmem>>, vector<1x32x256xf32>
    %68 = vector.shape_cast %67 : vector<1x32x256xf32> to vector<32x256xf32>
    %69 = vector.shape_cast %66 : vector<32x256xf32> to vector<1x32x256xf32>
    tpu.vector_store %arg7[%c0_27, %c0_28, %c0_29], %69 {strides = array<i32>} : memref<1x32x256xf32, #tpu.memory_space<vmem>>, vector<1x32x256xf32>,
    return
  }
  func.func @transform_0(%arg0: i32, %arg1: i32) -> (i32, i32, i32) {
    %c0_i32 = arith.constant 0 : i32
    %c0_i32_0 = arith.constant 0 : i32
    return %arg0, %c0_i32, %arg1 : i32, i32, i32
  }
  func.func @transform_1(%arg0: i32, %arg1: i32) -> (i32, i32) {
    %c0_i32 = arith.constant 0 : i32
    %c0_i32_0 = arith.constant 0 : i32
    %c0_i32_1 = arith.constant 0 : i32
    return %c0_i32, %c0_i32_0 : i32, i32
  }
  func.func @transform_2(%arg0: i32, %arg1: i32) -> (i32, i32) {
    %c0_i32 = arith.constant 0 : i32
    %c0_i32_0 = arith.constant 0 : i32
    %c0_i32_1 = arith.constant 0 : i32
    return %c0_i32, %c0_i32_0 : i32, i32
  }
  func.func @transform_3(%arg0: i32, %arg1: i32) -> (i32, i32) {
    %c0_i32 = arith.constant 0 : i32
    %c0_i32_0 = arith.constant 0 : i32
    %c0_i32_1 = arith.constant 0 : i32
    return %c0_i32, %c0_i32_0 : i32, i32
  }
  func.func @transform_4(%arg0: i32, %arg1: i32) -> (i32, i32) {
    %c0_i32 = arith.constant 0 : i32
    %c0_i32_0 = arith.constant 0 : i32
    %c0_i32_1 = arith.constant 0 : i32
    return %c0_i32, %c0_i32_0 : i32, i32
  }
  func.func @transform_5(%arg0: i32, %arg1: i32) -> (i32, i32, i32) {
    %c0_i32 = arith.constant 0 : i32
    %c0_i32_0 = arith.constant 0 : i32
    return %arg0, %c0_i32, %arg1 : i32, i32, i32
  }
}

</mosaic_0001>

<bundles_post_ra>
// kernel: tpu_custom_call.1
= control target key start
LH: loop header
LB: loop body
LE: loop exit
PB: predicated region body
PF: predicated region fallthrough
CT: control target
= control target key end

     0   :  { %10 = vsyncpa [#allocation3], 0  ;;  %s2361_s0 = inlined_call_operand.vmem [shape: f32[2,32,256], index: 0, kind: input, shape index: {}]   ;;  %s2362_s1 = inlined_call_operand.vmem [shape: f32[32,3], index: 1, kind: input, shape index: {}]   ;;  %s2363_s2 = inlined_call_operand.vmem [shape: bf16[128,32], index: 2, kind: input, shape index: {}]   ;;  %s2364_s3 = inlined_call_operand.vmem [shape: f32[128,1], index: 3, kind: input, shape index: {}]   ;;  %s2365_s4 = inlined_call_operand.vmem [shape: bf16[32,128], index: 4, kind: input, shape index: {}]   ;;  %s2366_s5 = inlined_call_operand.hbm [shape: f32[2,32,256], index: 5, kind: output, shape index: {}]  }
   0x1   :  { %12 = vsyncpa [#allocation3 + $0x1], 0  ;;  %s1623_s18 = smov 0   ;;  %s1625_s19 = smov 0  }
   0x2   :  { %s1627_s20 = smov 0   ;;  %s1629_s21 = smov 0  }
   0x3   :  { %s1631_s22 = smov 0   ;;  %s1633_s23 = smov 0  }
   0x4 LB: > { %s1272_s24 = sadd.s32 4294967295, %s1585_s23   ;;  %s1273_s25 = sadd.s32 4294967294, %s1585_s23   ;;  %s1585_s23 = sphi %s1633_s23, %s18_s23   ;;  %s1581_s22 = sphi %s1631_s22, %s2391_s22   ;;  %s1577_s21 = sphi %s1629_s21, %s2390_s21   ;;  %s1573_s20 = sphi %s1627_s20, %s2389_s20   ;;  %s1569_s19 = sphi %s1625_s19, %s2388_s19   ;;  %s1565_s18 = sphi %s1623_s18, %s2387_s18  }
   0x5   : > { %s30_s26 = sadd.s32 1, %s1581_s22  ;;  %s151_s27 = sadd.s32 1, %s1573_s20 }
   0x6   : > { %p32_p0 = scmp.ge.s32.totalorder %s30_s26, 2  ;;  %p161_p1 = scmp.ne.s32.totalorder %s1573_s20, %s1569_s19 }
   0x7   : > { %p162_p2 = scmp.eq.s32.totalorder %s1272_s24, 1  ;;  %p167_p3 = scmp.ne.s32.totalorder %s1569_s19, %s1565_s18 }
   0x8   : > { %s2393_s26 = smov (%p32_p0, %s30_s26), 0  ;;  %p168_p5 = scmp.eq.s32.totalorder %s1273_s25, 1 }
   0x9   : > { %p1663_p4 = por %p162_p2, %p161_p1  ;;  %s146_s29 = ssub.s32 %s1581_s22, %s2393_s26 }
   0xa   : > { %p1276_p6 = scmp.ge.s32.totalorder %s1585_s23, 1  ;;  %p149_p7 = scmp.eq.s32.totalorder %s146_s29, 0 }
   0xb   : > { %p1670_p8 = por %p168_p5, %p167_p3  ;;  %p211_p9 = scmp.lt.s32.totalorder %s1585_s23, 3 }
   0xc   : > { %s1676_s6 = scalar_select %p149_p7, %s1573_s20, %s151_s27  }
   0xd   : > { %p212_p10 = pnand %p1276_p6, %p211_p9 }
   0xf   : > { %215 = sbr.rel (%p212_p10) target bundleno = 661 (0x295), region = 40 }
  0x14   : > { %v265_v0 = vld [vmem:[%s2362_s1 + $0x10] sm:$0xff]  ;;  %v264_v1 = vld [vmem:[%s2362_s1 + $0x8] sm:$0xff]  ;;  %v263_v2 = vld [vmem:[%s2362_s1] sm:$0xff]  ;;  %v1587_v3 = vmov 1   ;;  %v1588_v4 = vmov 0   ;;  %p244_p11 = scmp.lt.s32.totalorder %s1577_s21, 1 }
  0x15   : > { %1421 = vset.pattern.permute.xlu2 %v1587_v3  ;;  %1419 = vset.pattern.permute.xlu1 %v1588_v4  ;;  %v266_v5 = vld [vmem:[%s2362_s1 + $0x18] sm:$0xff]  ;;  %v540_v6 = vld [vmem:[%s2364_s3 + $0x70] sm:$0xff]  ;;  %v1589_v15 = vmov 32.0   ;;  %v538_v20 = vld [vmem:[%s2364_s3 + $0x60] sm:$0xff]  ;;  %vm662_vm13 = vcmask 261120   ;;  %s240_s27 = sand.u32 1, %s1569_s19  }
  0x16   : > { %1418 = vset.pattern.permute.xlu0 %v1588_v4  ;;  %372 = vperm.xlu1 %1419, %v265_v0   ;;  %s245_s15 = scalar_select %p244_p11, %s1577_s21, 1  ;;  %1429 = vrcp.f32 %v1589_v15  ;;  %v537_v32 = vld [vmem:[%s2364_s3 + $0x58] sm:$0xff]  ;;  %v535_v44 = vld [vmem:[%s2364_s3 + $0x48] sm:$0xff]  ;;  %v530_v61 = vld [vmem:[%s2364_s3 + $0x20] sm:$0xff] }
  0x17   : > { %393 = vperm.xlu2 %1421, %v264_v1   ;;  %362 = vperm.xlu0 %1418, %v263_v2   ;;  %s1352_s8 = sshll.u32 %s1577_s21, 6  ;;  %s1176_s14 = scalar_lea.sflag [#allocation3], %s240_s27 }
  0x18   : > { %s1341_s16 = sshll.u32 %s245_s15, 6  ;;  %s1189_s11 = scalar_lea.hbm %s2366_s5, %s1352_s8 }
  0x19   : > { %s251_s29 = scalar_lea.vmem %s2361_s0, %s1341_s16  ;;  %s1192_s13 = sshll.u32 %s1189_s11, 4  ;;  %s1193_s13 = int_to_ptr.hbm [resolvable:$true] %s1192_s13 }
  0x1a   : > { %v1698_v7 = vld [vmem:[%s251_s29] sm:$0xff]  ;;  %v1700_v8 = vld [vmem:[%s251_s29 + $0x8] sm:$0xff]  ;;  %v1702_v9 = vld [vmem:[%s251_s29 + $0x10] sm:$0xff]  ;;  %s1521_s21 = sshra.s32 %s1193_s13, 4  ;;  %s1527_s24 = scalar_lea.hbm %s2366_s5, 128  ;;  %s1522_s21 = int_to_ptr.hbm [resolvable:$true] %s1521_s21 }
  0x1b   : > { %v1704_v10 = vld [vmem:[%s251_s29 + $0x18] sm:$0xff]  ;;  %v1706_v11 = vld [vmem:[%s251_s29 + $0x20] sm:$0xff]  ;;  %v1708_v12 = vld [vmem:[%s251_s29 + $0x28] sm:$0xff]  ;;  %v267_v13 = vadd.f32 %v1702_v9, %v1698_v7  ;;  %s1523_s15 = scalar_lea.hbm %s1522_s21, 64  ;;  %p1528_p1 = scmp.lt.s32.totalorder %s1522_s21, %s2366_s5 }
  0x1c   : > { %v276_v14 = vadd.f32 %v1704_v10, %v1700_v8  ;;  %v1714_v16 = vld [vmem:[%s251_s29 + $0x30] sm:$0xff]  ;;  %v1716_v17 = vld [vmem:[%s251_s29 + $0x38] sm:$0xff]  ;;  %v1430_v25 = vpop.eup %1429  ;;  %s1277_s29 = sshll.u32 %s240_s27, 6  ;;  %p1524_p12 = scmp.ne.s32.totalorder %s1522_s21, %s1523_s15 }
  0x1d   : > { %v268_v18 = vadd.f32 %v267_v13, %v1706_v11  ;;  %v286_v26 = vmul.f32 32.0, %v1430_v25  ;;  %vm290_vm0 = vweird.f32 %v1430_v25  ;;  %s2305_s7 = scalar_lea.vmem [#allocation2], %s1277_s29  ;;  %p1529_p2 = scmp.lt.s32.totalorder %s1527_s24, %s1523_s15 }
  0x1e   : > { %1420 = vset.pattern.permute.xlu1 %v1587_v3  ;;  %v277_v19 = vadd.f32 %v276_v14, %v1708_v12  ;;  %s1190_s12 = sshll.u32 %s2305_s7, 4  ;;  %p1525_p13 = pnand %p1524_p12, %p1663_p4  ;;  %s1191_s12 = int_to_ptr.vmem [resolvable:$true] %s1190_s12 }
  0x1f   : > { %1422 = vset.pattern.permute.xlu2 %v1588_v4  ;;  %367 = vperm.xlu0 %1418, %v264_v1   ;;  %v269_v21 = vadd.f32 %v268_v18, %v1714_v16  ;;  %v287_v29 = vsub.f32 1.0, %v286_v26  ;;  %p1530_p3 = por %p1529_p2, %p1528_p1 }
  0x20   : > { %377 = vperm.xlu2 %1422, %v266_v5   ;;  %389 = vperm.xlu1 %1420, %v263_v2   ;;  %v278_v22 = vadd.f32 %v277_v19, %v1716_v17  ;;  %p1526_p0 = pneg %p1525_p13 }
  0x21   : > { %v270_v23 = vrot.slane %v269_v21, 4  ;;  %v288_v33 = vmul.f32 %v1430_v25, %v287_v29 }
  0x22   : > { %v279_v24 = vrot.slane %v278_v22, 4  ;;  %p1531_p5 = pnand %p1530_p3, %p1526_p0 }
  0x23   : > { %v271_v27 = vadd.f32 %v270_v23, %v269_v21  ;;  %v289_v36 = vadd.f32 %v1430_v25, %v288_v33 }
  0x24   : > { %v280_v28 = vadd.f32 %v279_v24, %v278_v22 }
  0x25   : > { %v272_v30 = vrot.slane %v271_v27, 2  ;;  %v1728_v39 = vsel %vm290_vm0, %v1430_v25, %v289_v36 }
  0x26   : > { %v281_v31 = vrot.slane %v280_v28, 2 }
  0x27   : > { %1423 = vset.pattern.permute.xlu0 %v1587_v3  ;;  %v273_v34 = vadd.f32 %v272_v30, %v271_v27 }
  0x28   : > { %614 = vperm.xlu2 %1422, %v540_v6   ;;  %401 = vperm.xlu1 %1420, %v266_v5   ;;  %v282_v35 = vadd.f32 %v281_v31, %v280_v28 }
  0x29   : > { %397 = vperm.xlu0 %1423, %v265_v0   ;;  %v274_v37 = vrot.slane %v273_v34, 1 }
  0x2a   : > { %v283_v38 = vrot.slane %v282_v35, 1 }
  0x2b   : > { %v275_v40 = vadd.f32 %v274_v37, %v273_v34 }
  0x2c   : > { %v284_v41 = vadd.f32 %v283_v38, %v282_v35 }
  0x2d   : > { %v292_v42 = vmul.f32 %v1728_v39, %v275_v40 }
  0x2e   : > { %v293_v43 = vmul.f32 %v1728_v39, %v284_v41 }
  0x2f   : > { %v1736_v45 = vsub.f32 %v1698_v7, %v292_v42  ;;  %v1742_v47 = vsub.f32 %v1702_v9, %v292_v42  ;;  %v1748_v49 = vsub.f32 %v1706_v11, %v292_v42  ;;  %v1762_v55 = vsub.f32 %v1714_v16, %v292_v42 }
  0x30   : > { %604 = vperm.xlu2 %1422, %v538_v20   ;;  %1424 = vset.pattern.permute.xlu1 %v1588_v4  ;;  %v1739_v46 = vsub.f32 %v1700_v8, %v293_v43  ;;  %v1745_v48 = vsub.f32 %v1704_v10, %v293_v43  ;;  %v1751_v50 = vsub.f32 %v1708_v12, %v293_v43 }
  0x31   : > { %1425 = vset.pattern.permute.xlu0 %v1588_v4  ;;  %v302_v51 = vmul.f32 %v1736_v45, %v1736_v45  ;;  %v304_v53 = vmul.f32 %v1742_v47, %v1742_v47  ;;  %v306_v56 = vmul.f32 %v1748_v49, %v1748_v49  ;;  %v1767_v58 = vsub.f32 %v1716_v17, %v293_v43  ;;  %v529_v4 = vld [vmem:[%s2364_s3 + $0x18] sm:$0xff] }
  0x32   : > { %v303_v52 = vmul.f32 %v1739_v46, %v1739_v46  ;;  %v305_v54 = vmul.f32 %v1745_v48, %v1745_v48  ;;  %v307_v59 = vmul.f32 %v1751_v50, %v1751_v50  ;;  %v308_v62 = vmul.f32 %v1762_v55, %v1762_v55 }
  0x33   : > { %v310_v57 = vadd.f32 %v304_v53, %v302_v51  ;;  %v309_v0 = vmul.f32 %v1767_v58, %v1767_v58  ;;  %v539_v51 = vld [vmem:[%s2364_s3 + $0x68] sm:$0xff] }
  0x34   : > { %v319_v60 = vadd.f32 %v305_v54, %v303_v52  ;;  %609 = vperm.xlu0 %1425, %v539_v51  }
  0x35   : > { %v311_v63 = vadd.f32 %v310_v57, %v306_v56 }
  0x36   : > { %v320_v1 = vadd.f32 %v319_v60, %v307_v59 }
  0x37   : > { %v312_v2 = vadd.f32 %v311_v63, %v308_v62 }
  0x38   : > { %599 = vperm.xlu2 %1422, %v537_v32   ;;  %v321_v3 = vadd.f32 %v320_v1, %v309_v0  ;;  %v536_v1 = vld [vmem:[%s2364_s3 + $0x50] sm:$0xff] }
  0x39   : > { %v313_v5 = vrot.slane %v312_v2, 4 }
  0x3a   : > { %v322_v6 = vrot.slane %v321_v3, 4 }
  0x3b   : > { %v314_v13 = vadd.f32 %v313_v5, %v312_v2 }
  0x3c   : > { %v323_v14 = vadd.f32 %v322_v6, %v321_v3 }
  0x3d   : > { %v315_v15 = vrot.slane %v314_v13, 2 }
  0x3e   : > { %v324_v18 = vrot.slane %v323_v14, 2 }
  0x3f   : > { %v316_v19 = vadd.f32 %v315_v15, %v314_v13 }
  0x40   : > { %589 = vperm.xlu2 %1422, %v535_v44   ;;  %v325_v20 = vadd.f32 %v324_v18, %v323_v14  ;;  %v541_v44 = vld [vmem:[%s2364_s3 + $0x78] sm:$0xff] }
  0x41   : > { %v317_v21 = vrot.slane %v316_v19, 1  ;;  %619 = vperm.xlu1 %1424, %v541_v44  }
  0x42   : > { %v326_v22 = vrot.slane %v325_v20, 1 }
  0x43   : > { %v318_v23 = vadd.f32 %v317_v21, %v316_v19 }
  0x44   : > { %v327_v24 = vadd.f32 %v326_v22, %v325_v20 }
  0x45   : > { %v328_v25 = vmul.f32 %v318_v23, %v1728_v39 }
  0x46   : > { %v329_v26 = vmul.f32 %v327_v24, %v1728_v39 }
  0x47   : > { %v330_v27 = vadd.f32 1e-05, %v328_v25 }
  0x48   : > { %564 = vperm.xlu2 %1422, %v530_v61   ;;  %v331_v28 = vadd.f32 1e-05, %v329_v26 }
  0x49   : > { %1431 = vrsqrt.f32 %v330_v27  ;;  %vm338_vm1 = vweird.f32 %v330_v27  ;;  %594 = vperm.xlu1 %1424, %v536_v1  }
  0x4a   : > { %1433 = vrsqrt.f32 %v331_v28  ;;  %vm348_vm3 = vweird.f32 %v331_v28 }
  0x4f   : > { %v1432_v29 = vpop.eup %1431 }
  0x50   : > { %559 = vperm.xlu2 %1422, %v529_v4   ;;  %v1434_v30 = vpop.eup %1433  ;;  %v333_v31 = vmul.f32 %v1432_v29, %v330_v27  ;;  %vm339_vm2 = vweird.f32 %v1432_v29 }
  0x51   : > { %v343_v32 = vmul.f32 %v1434_v30, %v331_v28  ;;  %vm349_vm4 = vweird.f32 %v1434_v30  ;;  %vm340_vm5 = vmor %vm338_vm1, %vm339_vm2 }
  0x52   : > { %v334_v33 = vmul.f32 %v1432_v29, %v333_v31  ;;  %vm350_vm6 = vmor %vm348_vm3, %vm349_vm4 }
  0x53   : > { %v344_v34 = vmul.f32 %v1434_v30, %v343_v32 }
  0x54   : > { %v335_v35 = vmul.f32 0.5, %v334_v33 }
  0x55   : > { %v345_v36 = vmul.f32 0.5, %v344_v34 }
  0x56   : > { %v336_v37 = vsub.f32 1.5, %v335_v35 }
  0x57   : > { %v346_v38 = vsub.f32 1.5, %v345_v36 }
  0x58   : > { %v337_v41 = vmul.f32 %v1432_v29, %v336_v37 }
  0x59   : > { %v347_v42 = vmul.f32 %v1434_v30, %v346_v38 }
  0x5a   : > { %v341_v53 = vsel %vm340_vm5, %v1432_v29, %v337_v41 }
  0x5b   : > { %v351_v54 = vsel %vm350_vm6, %v1434_v30, %v347_v42  ;;  %v354_v56 = vmul.f32 %v341_v53, %v1742_v47  ;;  %v352_v59 = vmul.f32 %v341_v53, %v1736_v45  ;;  %v358_v2 = vmul.f32 %v341_v53, %v1762_v55 }
  0x5c   : > { %v355_v57 = vmul.f32 %v351_v54, %v1745_v48  ;;  %v353_v60 = vmul.f32 %v351_v54, %v1739_v46  ;;  %v359_v3 = vmul.f32 %v351_v54, %v1767_v58  ;;  %v356_v48 = vmul.f32 %v341_v53, %v1748_v49 }
  0x5d   : > { %v357_v45 = vmul.f32 %v351_v54, %v1751_v50 }
  0x71   : > { %v394_v52 = vpop.permute.xlu2 %393 }
  0x7a   : > { %v378_v14 = vpop.permute.xlu2 %377 }
  0x7b   : > { %v386_v15 = vmul.f32 %v378_v14, %v358_v2  ;;  %v387_v18 = vmul.f32 %v378_v14, %v359_v3 }
  0x88   : > { %v373_v40 = vpop.permute.xlu1 %372 }
  0x89   : > { %v363_v43 = vpop.permute.xlu0 %362  ;;  %v384_v19 = vmul.f32 %v373_v40, %v356_v48  ;;  %v385_v20 = vmul.f32 %v373_v40, %v357_v45 }
  0x8a   : > { %v380_v4 = vmul.f32 %v363_v43, %v352_v59  ;;  %v381_v47 = vmul.f32 %v363_v43, %v353_v60 }
  0x91   : > { %v368_v61 = vpop.permute.xlu0 %367 }
  0x92   : > { %v382_v62 = vmul.f32 %v368_v61, %v354_v56  ;;  %v383_v63 = vmul.f32 %v368_v61, %v355_v57  ;;  %v390_v0 = vpop.permute.xlu1 %389 }
  0x93   : > { %v404_v6 = vadd.f32 %v390_v0, %v380_v4  ;;  %v405_v13 = vadd.f32 %v390_v0, %v381_v47 }
  0x94   : > { %v406_v46 = vadd.f32 %v394_v52, %v382_v62  ;;  %v407_v5 = vadd.f32 %v394_v52, %v383_v63 }
  0x95   : > { %v1807_v49 = vadd.f32 %v404_v6, %v1698_v7  ;;  %v1810_v50 = vadd.f32 %v405_v13, %v1700_v8 }
  0x96   : > { %v1801_v55 = vadd.f32 %v406_v46, %v1702_v9  ;;  %v1804_v58 = vadd.f32 %v407_v5, %v1704_v10 }
  0x97   : > { %2376 = vst [vmem:[#allocation6_spill] sm:$0xff] %v1807_v49 }
  0x98   : > { %2375 = vst [vmem:[#allocation5_spill] sm:$0xff] %v1801_v55  ;;  %v420_v27 = vadd.f32 %v1801_v55, %v1807_v49  ;;  %v429_v9 = vadd.f32 %v1804_v58, %v1810_v50 }
  0x9a   : > { %v402_v21 = vpop.permute.xlu1 %401 }
  0x9b   : > { %v398_v22 = vpop.permute.xlu0 %397  ;;  %v410_v23 = vadd.f32 %v402_v21, %v386_v15  ;;  %v411_v24 = vadd.f32 %v402_v21, %v387_v18 }
  0x9c   : > { %v408_v25 = vadd.f32 %v398_v22, %v384_v19  ;;  %v409_v26 = vadd.f32 %v398_v22, %v385_v20  ;;  %v534_v22 = vld [vmem:[%s2364_s3 + $0x40] sm:$0xff] }
  0x9d   : > { %v1823_v8 = vadd.f32 %v410_v23, %v1714_v16  ;;  %v1826_v28 = vadd.f32 %v411_v24, %v1716_v17  ;;  %v532_v23 = vld [vmem:[%s2364_s3 + $0x30] sm:$0xff]  ;;  %584 = vperm.xlu1 %1424, %v534_v22  }
  0x9e   : > { %v1817_v10 = vadd.f32 %v408_v25, %v1706_v11  ;;  %v1820_v7 = vadd.f32 %v409_v26, %v1708_v12  ;;  %574 = vperm.xlu0 %1425, %v532_v23  }
  0x9f   : > { %2379 = vst [vmem:[#allocation9_spill] sm:$0xff] %v1823_v8 }
  0xa0   : > { %2377 = vst [vmem:[#allocation7_spill] sm:$0xff] %v1817_v10  ;;  %v421_v29 = vadd.f32 %v420_v27, %v1817_v10  ;;  %v430_v30 = vadd.f32 %v429_v9, %v1820_v7 }
  0xa1   : > { %2378 = vst [vmem:[#allocation8_spill] sm:$0xff] %v1820_v7 }
  0xa2   : > { %2380 = vst [vmem:[#allocation10_spill] sm:$0xff] %v1826_v28  ;;  %v422_v31 = vadd.f32 %v421_v29, %v1823_v8  ;;  %v431_v32 = vadd.f32 %v430_v30, %v1826_v28 }
  0xa4   : > { %v423_v33 = vrot.slane %v422_v31, 4  ;;  %v432_v11 = vrot.slane %v431_v32, 4 }
  0xa6   : > { %v424_v34 = vadd.f32 %v423_v33, %v422_v31  ;;  %v433_v35 = vadd.f32 %v432_v11, %v431_v32  ;;  %v533_v31 = vld [vmem:[%s2364_s3 + $0x38] sm:$0xff]  ;;  %v531_v32 = vld [vmem:[%s2364_s3 + $0x28] sm:$0xff]  ;;  %v528_v11 = vld [vmem:[%s2364_s3 + $0x10] sm:$0xff] }
  0xa7   : > { %579 = vperm.xlu1 %1424, %v533_v31   ;;  %569 = vperm.xlu0 %1425, %v531_v32  }
  0xa8   : > { %v425_v12 = vrot.slane %v424_v34, 2  ;;  %v434_v36 = vrot.slane %v433_v35, 2 }
  0xaa   : > { %v426_v37 = vadd.f32 %v425_v12, %v424_v34  ;;  %v435_v16 = vadd.f32 %v434_v36, %v433_v35 }
  0xac   : > { %v427_v38 = vrot.slane %v426_v37, 1  ;;  %v436_v40 = vrot.slane %v435_v16, 1 }
  0xae   : > { %v428_v17 = vadd.f32 %v427_v38, %v426_v37  ;;  %v437_v41 = vadd.f32 %v436_v40, %v435_v16 }
  0xaf   : > { %554 = vperm.xlu1 %1424, %v528_v11  }
  0xb0   : > { %v438_v42 = vmul.f32 %v428_v17, %v1728_v39  ;;  %v439_v43 = vmul.f32 %v437_v41, %v1728_v39 }
  0xb2   : > { %v1835_v44 = vsub.f32 %v1807_v49, %v438_v42  ;;  %v1838_v51 = vsub.f32 %v1801_v55, %v438_v42  ;;  %v1841_v52 = vsub.f32 %v1817_v10, %v438_v42  ;;  %v1844_v53 = vsub.f32 %v1810_v50, %v439_v43 }
  0xb3   : > { %v1847_v54 = vsub.f32 %v1804_v58, %v439_v43  ;;  %v1850_v56 = vsub.f32 %v1820_v7, %v439_v43  ;;  %v1853_v57 = vsub.f32 %v1823_v8, %v438_v42  ;;  %v1860_v61 = vsub.f32 %v1826_v28, %v439_v43  ;;  %v527_v42 = vld [vmem:[%s2364_s3 + $0x8] sm:$0xff] }
  0xb4   : > { %v448_v59 = vmul.f32 %v1835_v44, %v1835_v44  ;;  %v450_v60 = vmul.f32 %v1838_v51, %v1838_v51  ;;  %v449_v62 = vmul.f32 %v1844_v53, %v1844_v53  ;;  %v452_v0 = vmul.f32 %v1841_v52, %v1841_v52 }
  0xb5   : > { %v451_v63 = vmul.f32 %v1847_v54, %v1847_v54  ;;  %v453_v2 = vmul.f32 %v1850_v56, %v1850_v56  ;;  %v454_v4 = vmul.f32 %v1853_v57, %v1853_v57  ;;  %v455_v48 = vmul.f32 %v1860_v61, %v1860_v61 }
  0xb6   : > { %v456_v1 = vadd.f32 %v450_v60, %v448_v59 }
  0xb7   : > { %v465_v3 = vadd.f32 %v451_v63, %v449_v62  ;;  %549 = vperm.xlu1 %1424, %v527_v42  }
  0xb8   : > { %v457_v47 = vadd.f32 %v456_v1, %v452_v0 }
  0xb9   : > { %v466_v45 = vadd.f32 %v465_v3, %v453_v2 }
  0xba   : > { %v458_v46 = vadd.f32 %v457_v47, %v454_v4 }
  0xbb   : > { %v467_v5 = vadd.f32 %v466_v45, %v455_v48 }
  0xbc   : > { %v459_v6 = vrot.slane %v458_v46, 4 }
  0xbd   : > { %v468_v13 = vrot.slane %v467_v5, 4 }
  0xbe   : > { %v460_v14 = vadd.f32 %v459_v6, %v458_v46  ;;  %v1346_v6 = vld [vmem:[%s2363_s2 + $0x20] sm:$0xff] }
  0xbf   : > { %v469_v15 = vadd.f32 %v468_v13, %v467_v5  ;;  %v1345_v5 = vld [vmem:[%s2363_s2 + $0x18] sm:$0xff]  ;;  %v1945_v13 = vpop.permute.xlu1 %619 }
  0xc0   : > { %v461_v18 = vrot.slane %v460_v14, 2 }
  0xc1   : > { %v470_v19 = vrot.slane %v469_v15, 2 }
  0xc2   : > { %v462_v20 = vadd.f32 %v461_v18, %v460_v14 }
  0xc3   : > { %v471_v21 = vadd.f32 %v470_v19, %v469_v15  ;;  %v610_v15 = vpop.permute.xlu0 %609 }
  0xc4   : > { %v463_v24 = vrot.slane %v462_v20, 1 }
  0xc5   : > { %v472_v25 = vrot.slane %v471_v21, 1 }
  0xc6   : > { %v464_v26 = vadd.f32 %v463_v24, %v462_v20  ;;  %v1953_v20 = vpop.permute.xlu2 %614 }
  0xc7   : > { %v473_v27 = vadd.f32 %v472_v25, %v471_v21  ;;  %v1947_v14 = vpop.permute.xlu1 %594 }
  0xc8   : > { %v474_v9 = vmul.f32 %v464_v26, %v1728_v39 }
  0xc9   : > { %v475_v29 = vmul.f32 %v473_v27, %v1728_v39  ;;  %v526_v39 = vld [vmem:[%s2364_s3] sm:$0xff] }
  0xca   : > { %v476_v30 = vadd.f32 1e-05, %v474_v9  ;;  %544 = vperm.xlu0 %1425, %v526_v39  }
  0xcb   : > { %v477_v33 = vadd.f32 1e-05, %v475_v29 }
  0xcc   : > { %1435 = vrsqrt.f32 %v476_v30  ;;  %vm484_vm9 = vweird.f32 %v476_v30 }
  0xcd   : > { %1437 = vrsqrt.f32 %v477_v33  ;;  %vm494_vm11 = vweird.f32 %v477_v33 }
  0xce   : > { %v605_v25 = vpop.permute.xlu2 %604 }
  0xd2   : > { %v1436_v34 = vpop.eup %1435 }
  0xd3   : > { %v1438_v35 = vpop.eup %1437  ;;  %v479_v12 = vmul.f32 %v1436_v34, %v476_v30  ;;  %vm485_vm7 = vweird.f32 %v1436_v34 }
  0xd4   : > { %v489_v36 = vmul.f32 %v1438_v35, %v477_v33  ;;  %vm495_vm8 = vweird.f32 %v1438_v35  ;;  %vm486_vm10 = vmor %vm484_vm9, %vm485_vm7 }
  0xd5   : > { %v480_v37 = vmul.f32 %v1436_v34, %v479_v12  ;;  %vm496_vm12 = vmor %vm494_vm11, %vm495_vm8 }
  0xd6   : > { %v490_v16 = vmul.f32 %v1438_v35, %v489_v36  ;;  %v1963_v32 = vpop.permute.xlu2 %599 }
  0xd7   : > { %v481_v38 = vmul.f32 0.5, %v480_v37 }
  0xd8   : > { %v491_v40 = vmul.f32 0.5, %v490_v16 }
  0xd9   : > { %v482_v17 = vsub.f32 1.5, %v481_v38 }
  0xda   : > { %v492_v41 = vsub.f32 1.5, %v491_v40 }
  0xdb   : > { %v483_v43 = vmul.f32 %v1436_v34, %v482_v17 }
  0xdc   : > { %v493_v59 = vmul.f32 %v1438_v35, %v492_v41 }
  0xdd   : > { %v487_v60 = vsel %vm486_vm10, %v1436_v34, %v483_v43 }
  0xde   : > { %v502_v62 = vmul.f32 %v487_v60, %v1841_v52  ;;  %v504_v63 = vmul.f32 %v487_v60, %v1853_v57  ;;  %v497_v0 = vsel %vm496_vm12, %v1438_v35, %v493_v59  ;;  %v498_v4 = vmul.f32 %v487_v60, %v1835_v44  ;;  %v1348_v44 = vld [vmem:[%s2363_s2 + $0x30] sm:$0xff]  ;;  %v1985_v43 = vpop.permute.xlu2 %589 }
  0xdf   : > { %v503_v1 = vmul.f32 %v497_v0, %v1850_v56  ;;  %v505_v2 = vmul.f32 %v497_v0, %v1860_v61  ;;  %v500_v47 = vmul.f32 %v487_v60, %v1838_v51  ;;  %v499_v45 = vmul.f32 %v497_v0, %v1844_v53  ;;  %v1342_v56 = vld [vmem:[%s2363_s2] sm:$0xff]  ;;  %v1347_v51 = vld [vmem:[%s2363_s2 + $0x28] sm:$0xff]  ;;  %v1344_v61 = vld [vmem:[%s2363_s2 + $0x10] sm:$0xff] }
  0xe0   : > { %v524_v3 = vpack.c.bf16 %v504_v63, %v502_v62  ;;  %v501_v46 = vmul.f32 %v497_v0, %v1847_v54  ;;  %v1343_v53 = vld [vmem:[%s2363_s2 + $0x8] sm:$0xff]  ;;  %v1349_v54 = vld [vmem:[%s2363_s2 + $0x38] sm:$0xff] }
  0xe1   : > { %v525_v48 = vpack.c.bf16 %v505_v2, %v503_v1  ;;  %v522_v52 = vpack.c.bf16 %v500_v47, %v498_v4 }
  0xe2   : > { %693 = vmatpush.bf16.msra.mxu0 %v524_v3  ;;  %1353 = vmatpush.bf16.msra.mxu2 %v524_v3  ;;  %v523_v57 = vpack.c.bf16 %v501_v46, %v499_v45 }
  0xe3   : > { %742 = vmatpush.bf16.msra.mxu1 %v525_v48  ;;  %1355 = vmatpush.bf16.msra.mxu3 %v525_v48 }
  0xe6   : > { %694 = vmatpush.bf16.msra.mxu0 %v522_v52  ;;  %1354 = vmatpush.bf16.msra.mxu2 %v522_v52 }
  0xe7   : > { %743 = vmatpush.bf16.msra.mxu1 %v523_v57  ;;  %1356 = vmatpush.bf16.msra.mxu3 %v523_v57 }
  0xe9   : > { %1312 = vmatmul.msk.bf16.vlgmr.msra.gmra.mxu0 %vm662_vm13, %v1342_v56  ;;  %1318 = vmatmul.msk.bf16.vlgmr.msra.gmra.mxu2 %vm662_vm13, %v1348_v44 }
  0xea   : > { %1320 = vmatmul.msk.bf16.vlgmr.msra.gmra.mxu1 %vm662_vm13, %v1342_v56  ;;  %1325 = vmatmul.msk.bf16.vlgmr.msra.gmra.mxu3 %vm662_vm13, %v1347_v51 }
  0xf9   : > { %1313 = vmatmul.msk.bf16.gmra.mxu0 %vm662_vm13, %v1343_v53  ;;  %1319 = vmatmul.msk.bf16.gmra.mxu2 %vm662_vm13, %v1349_v54 }
  0xfa   : > { %1321 = vmatmul.msk.bf16.gmra.mxu1 %vm662_vm13, %v1343_v53  ;;  %1326 = vmatmul.msk.bf16.gmra.mxu3 %vm662_vm13, %v1348_v44 }
 0x109   : > { %1314 = vmatmul.msk.bf16.gmra.mxu0 %vm662_vm13, %v1344_v61 }
 0x10a   : > { %1322 = vmatmul.msk.bf16.gmra.mxu1 %vm662_vm13, %v1344_v61  ;;  %1327 = vmatmul.msk.bf16.gmra.mxu3 %vm662_vm13, %v1349_v54 }
 0x10f   : > { %v1949_v18 = vpop.permute.xlu1 %584 }
 0x110   : > { %v1951_v19 = vpop.permute.xlu0 %574 }
 0x119   : > { %1315 = vmatmul.msk.bf16.gmra.mxu0 %vm662_vm13, %v1345_v5  ;;  %v1955_v21 = vpop.permute.xlu1 %579  ;;  %v1957_v22 = vpop.permute.xlu0 %569 }
 0x11a   : > { %1323 = vmatmul.msk.bf16.gmra.mxu1 %vm662_vm13, %v1345_v5 }
 0x121   : > { %v1959_v26 = vpop.permute.xlu1 %554 }
 0x129   : > { %1316 = vmatmul.msk.bf16.gmra.mxu0 %vm662_vm13, %v1346_v6  ;;  %v1967_v11 = vpop.permute.xlu1 %549 }
 0x12a   : > { %1324 = vmatmul.msk.bf16.gmra.mxu1 %vm662_vm13, %v1346_v6 }
 0x139   : > { %1317 = vmatmul.msk.bf16.gmra.mxu0 %vm662_vm13, %v1347_v51 }
 0x13c   : > { %v545_v30 = vpop.permute.xlu0 %544 }
 0x166   : > { %v696_v23 = vpop.f32.mrf.mxu0 }
 0x167   : > { %v745_v24 = vpop.f32.mrf.mxu1 }
 0x168   : > { %v1965_v33 = vadd.f32 %v745_v24, %v545_v30 }
 0x16a   : > { %v786_v36 = vmul.f32 %v1965_v33, %v1965_v33 }
 0x16c   : > { %v726_v27 = vpop.f32.mrf.mxu2  ;;  %v818_v41 = vmul.f32 %v786_v36, %v1965_v33 }
 0x16d   : > { %v770_v9 = vpop.f32.mrf.mxu3  ;;  %v1969_v39 = vadd.f32 %v726_v27, %v605_v25 }
 0x16e   : > { %v1961_v29 = vpop.f32.mrf.mxu0  ;;  %v1989_v60 = vadd.f32 %v770_v9, %v1947_v14  ;;  %v850_v2 = vmul.f32 0.044715, %v818_v41  ;;  %v2025_v41 = vadd.f32 %v696_v23, %v545_v30 }
 0x16f   : > { %v747_v31 = vpop.f32.mrf.mxu1  ;;  %v809_v40 = vmul.f32 %v1969_v39, %v1969_v39 }
 0x170   : > { %v1976_v37 = vadd.f32 %v747_v31, %v1967_v11  ;;  %v806_v46 = vmul.f32 %v1989_v60, %v1989_v60  ;;  %v882_v56 = vadd.f32 %v850_v2, %v1965_v33 }
 0x171   : > { %v841_v59 = vmul.f32 %v809_v40, %v1969_v39 }
 0x172   : > { %v788_v42 = vmul.f32 %v1976_v37, %v1976_v37  ;;  %v838_v61 = vmul.f32 %v806_v46, %v1989_v60 }
 0x173   : > { %v873_v45 = vmul.f32 0.044715, %v841_v59 }
 0x174   : > { %v728_v34 = vpop.f32.mrf.mxu2  ;;  %v820_v3 = vmul.f32 %v788_v42, %v1976_v37 }
 0x175   : > { %v1971_v35 = vadd.f32 %v728_v34, %v610_v15  ;;  %v772_v12 = vpop.f32.mrf.mxu3  ;;  %v905_v54 = vadd.f32 %v873_v45, %v1969_v39  ;;  %v2018_v34 = vpop.permute.xlu2 %564  ;;  %v785_v45 = vmul.f32 %v2025_v41, %v2025_v41 }
 0x176   : > { %v701_v16 = vpop.f32.mrf.mxu0  ;;  %v852_v44 = vmul.f32 0.044715, %v820_v3  ;;  %v2007_v51 = vadd.f32 %v772_v12, %v1963_v32 }
 0x177   : > { %v750_v38 = vpop.f32.mrf.mxu1  ;;  %v811_v17 = vmul.f32 %v1971_v35, %v1971_v35  ;;  %v2034_v2 = vadd.f32 %v701_v16, %v1959_v26 }
 0x178   : > { %v884_v12 = vadd.f32 %v852_v44, %v1976_v37  ;;  %v808_v42 = vmul.f32 %v2007_v51, %v2007_v51 }
 0x179   : > { %v843_v63 = vmul.f32 %v811_v17, %v1971_v35  ;;  %v914_v17 = vmul.f32 0.7978846, %v882_v56  ;;  %v2050_v56 = vadd.f32 %v750_v38, %v1959_v26  ;;  %v789_v44 = vmul.f32 %v2034_v2, %v2034_v2 }
 0x17a   : > { %v840_v46 = vmul.f32 %v808_v42, %v2007_v51  ;;  %v817_v26 = vmul.f32 %v785_v45, %v2025_v41 }
 0x17b   : > { %v875_v52 = vmul.f32 0.044715, %v843_v63  ;;  %v870_v63 = vmul.f32 0.044715, %v838_v61  ;;  %1439 = vtanh.f32 %v914_v17  ;;  %v790_v42 = vmul.f32 %v2050_v56, %v2050_v56 }
 0x17c   : > { %v731_v62 = vpop.f32.mrf.mxu2  ;;  %v2076_v45 = vmul.f32 0.044715, %v817_v26 }
 0x17d   : > { %v1993_v0 = vadd.f32 %v731_v62, %v1953_v20  ;;  %v775_v1 = vpop.f32.mrf.mxu3  ;;  %v907_v6 = vadd.f32 %v875_v52, %v1971_v35  ;;  %v902_v16 = vadd.f32 %v870_v63, %v1989_v60  ;;  %v821_v63 = vmul.f32 %v789_v44, %v2034_v2 }
 0x17e   : > { %v1996_v4 = vpop.f32.mrf.mxu0  ;;  %v2013_v27 = vadd.f32 %v775_v1, %v605_v25  ;;  %v937_v1 = vmul.f32 0.7978846, %v905_v54  ;;  %v822_v44 = vmul.f32 %v790_v42, %v2050_v56 }
 0x17f   : > { %v813_v47 = vmul.f32 %v1993_v0, %v1993_v0  ;;  %v2000_v48 = vpop.f32.mrf.mxu1  ;;  %v939_v30 = vmul.f32 0.7978846, %v907_v6 }
 0x180   : > { %v854_v55 = vmul.f32 0.044715, %v822_v44 }
 0x181   : > { %v845_v57 = vmul.f32 %v813_v47, %v1993_v0  ;;  %v916_v47 = vmul.f32 0.7978846, %v884_v12  ;;  %v560_v12 = vpop.permute.xlu2 %559 }
 0x183   : > { %v877_v53 = vmul.f32 0.044715, %v845_v57  ;;  %v2047_v57 = vadd.f32 %v1961_v29, %v1967_v11  ;;  %v872_v11 = vmul.f32 0.044715, %v840_v46 }
 0x184   : > { %v733_v5 = vpop.f32.mrf.mxu2 }
 0x185   : > { %v909_v24 = vadd.f32 %v877_v53, %v1993_v0  ;;  %v2016_v9 = vadd.f32 %v733_v5, %v1945_v13  ;;  %v777_v31 = vpop.f32.mrf.mxu3  ;;  %v787_v17 = vmul.f32 %v2047_v57, %v2047_v57  ;;  %v904_v46 = vadd.f32 %v872_v11, %v2007_v51 }
 0x186   : > { %v2021_v36 = vadd.f32 %v777_v31, %v610_v15  ;;  %v2023_v40 = vpop.f32.mrf.mxu0  ;;  %v810_v15 = vmul.f32 %v2013_v27, %v2013_v27  ;;  %v1440_v31 = vpop.eup %1439 }
 0x187   : > { %v815_v25 = vmul.f32 %v2016_v9, %v2016_v9  ;;  %v2031_v59 = vpop.f32.mrf.mxu1  ;;  %v941_v62 = vmul.f32 0.7978846, %v909_v24  ;;  %v936_v8 = vmul.f32 0.7978846, %v904_v46 }
 0x188   : > { %v812_v3 = vmul.f32 %v2021_v36, %v2021_v36  ;;  %v842_v53 = vmul.f32 %v810_v15, %v2013_v27  ;;  %v2073_v15 = vadd.f32 %v1996_v4, %v560_v12  ;;  %v853_v4 = vmul.f32 0.044715, %v821_v63 }
 0x189   : > { %v847_v23 = vmul.f32 %v815_v25, %v2016_v9  ;;  %1441 = vtanh.f32 %v941_v62  ;;  %v934_v25 = vmul.f32 0.7978846, %v902_v16  ;;  %v819_v16 = vmul.f32 %v787_v17, %v2047_v57 }
 0x18a   : > { %1443 = vtanh.f32 %v937_v1  ;;  %v844_v5 = vmul.f32 %v812_v3, %v2021_v36  ;;  %v874_v1 = vmul.f32 0.044715, %v842_v53 }
 0x18b   : > { %v879_v52 = vmul.f32 0.044715, %v847_v23  ;;  %1445 = vtanh.f32 %v939_v30 }
 0x18c   : > { %1447 = vtanh.f32 %v916_v47  ;;  %v876_v30 = vmul.f32 0.044715, %v844_v5  ;;  %v791_v5 = vmul.f32 %v2073_v15, %v2073_v15 }
 0x18d   : > { %v911_v54 = vadd.f32 %v879_v52, %v2016_v9  ;;  %v780_v61 = vpop.f32.mrf.mxu3  ;;  %v978_v52 = vadd.f32 1.0, %v1440_v31 }
 0x18e   : > { %v2058_v6 = vadd.f32 %v780_v61, %v1953_v20  ;;  %v2060_v29 = vpop.f32.mrf.mxu0  ;;  %v908_v26 = vadd.f32 %v876_v30, %v2021_v36 }
 0x18f   : > { %v2063_v38 = vpop.f32.mrf.mxu1  ;;  %v943_v24 = vmul.f32 0.7978846, %v911_v54  ;;  %v1442_v62 = vpop.eup %1441  ;;  %v1010_v10 = vmul.f32 0.5, %v978_v52  ;;  %v2100_v52 = vadd.f32 %v2031_v59, %v2018_v34 }
 0x190   : > { %v814_v20 = vmul.f32 %v2058_v6, %v2058_v6  ;;  %v1444_v23 = vpop.eup %1443  ;;  %v1005_v61 = vadd.f32 1.0, %v1442_v62  ;;  %v940_v46 = vmul.f32 0.7978846, %v908_v26 }
 0x191   : > { %1449 = vtanh.f32 %v943_v24  ;;  %v1446_v47 = vpop.eup %1445  ;;  %v906_v24 = vadd.f32 %v874_v1, %v2013_v27  ;;  %v1001_v63 = vadd.f32 1.0, %v1444_v23 }
 0x192   : > { %v846_v3 = vmul.f32 %v814_v20, %v2058_v6  ;;  %v1448_v54 = vpop.eup %1447  ;;  %1451 = vtanh.f32 %v934_v25  ;;  %v1003_v42 = vadd.f32 1.0, %v1446_v47  ;;  %v1037_v30 = vmul.f32 0.5, %v1005_v61 }
 0x193   : > { %v980_v1 = vadd.f32 1.0, %v1448_v54  ;;  %v938_v49 = vmul.f32 0.7978846, %v906_v24  ;;  %v1033_v44 = vmul.f32 0.5, %v1001_v63  ;;  %1453 = vtanh.f32 %v936_v8 }
 0x194   : > { %v878_v53 = vmul.f32 0.044715, %v846_v3  ;;  %v1035_v23 = vmul.f32 0.5, %v1003_v42  ;;  %v886_v24 = vadd.f32 %v854_v55, %v2050_v56  ;;  %v885_v8 = vadd.f32 %v853_v4, %v2034_v2 }
 0x195   : > { %v782_v20 = vpop.f32.mrf.mxu3  ;;  %v1012_v61 = vmul.f32 0.5, %v980_v1 }
 0x196   : > { %v910_v11 = vadd.f32 %v878_v53, %v2058_v6  ;;  %v2087_v31 = vadd.f32 %v782_v20, %v1945_v13  ;;  %v2089_v17 = vpop.f32.mrf.mxu0  ;;  %v823_v53 = vmul.f32 %v791_v5, %v2073_v15  ;;  %v2095_v13 = vadd.f32 %v2000_v48, %v560_v12 }
 0x197   : > { %v1450_v3 = vpop.eup %1449  ;;  %v760_v62 = vpop.f32.mrf.mxu1  ;;  %v1069_v5 = vmul.f32 %v1037_v30, %v1993_v0  ;;  %v851_v12 = vmul.f32 0.044715, %v819_v16  ;;  %v1067_v42 = vmul.f32 %v1035_v23, %v1971_v35  ;;  %v2116_v55 = vmul.f32 %v1012_v61, %v1976_v37 }
 0x198   : > { %v816_v25 = vmul.f32 %v2087_v31, %v2087_v31  ;;  %v1007_v28 = vadd.f32 1.0, %v1450_v3  ;;  %v942_v20 = vmul.f32 0.7978846, %v910_v11  ;;  %v1452_v54 = vpop.eup %1451  ;;  %v792_v0 = vmul.f32 %v2095_v13, %v2095_v13 }
 0x199   : > { %v1065_v35 = vmul.f32 %v1033_v44, %v1969_v39  ;;  %v1454_v63 = vpop.eup %1453  ;;  %v2132_v30 = vadd.f32 %v2063_v38, %v1957_v22 }
 0x19a   : > { %v848_v47 = vmul.f32 %v816_v25, %v2087_v31  ;;  %v1039_v7 = vmul.f32 0.5, %v1007_v28  ;;  %1455 = vtanh.f32 %v942_v20  ;;  %v855_v28 = vmul.f32 0.044715, %v823_v53 }
 0x19b   : > { %1457 = vtanh.f32 %v938_v49  ;;  %v794_v49 = vmul.f32 %v2100_v52, %v2100_v52  ;;  %v2126_v25 = vadd.f32 %v760_v62, %v1951_v19  ;;  %v1089_v53 = vpack.c.bf16 %v1067_v42, %v1065_v35 }
 0x19c   : > { %v880_v3 = vmul.f32 0.044715, %v848_v47  ;;  %v1071_v48 = vmul.f32 %v1039_v7, %v2016_v9  ;;  %1459 = vtanh.f32 %v940_v46  ;;  %v2113_v9 = vmul.f32 %v1010_v10, %v1965_v33 }
 0x19d   : > { %v887_v1 = vadd.f32 %v855_v28, %v2073_v15  ;;  %v998_v10 = vadd.f32 1.0, %v1452_v54  ;;  %v918_v20 = vmul.f32 0.7978846, %v886_v24  ;;  %v881_v47 = vadd.f32 %v2076_v45, %v2025_v41 }
 0x19e   : > { %v912_v26 = vadd.f32 %v880_v3, %v2087_v31  ;;  %v2106_v11 = vpop.f32.mrf.mxu0  ;;  %v1091_v59 = vpack.c.bf16 %v1071_v48, %v1069_v5  ;;  %v1078_v33 = vpack.c.bf16 %v2116_v55, %v2113_v9  ;;  %v2139_v46 = vadd.f32 %v851_v12, %v2047_v57 }
 0x19f   : > { %v762_v7 = vpop.f32.mrf.mxu1  ;;  %v824_v54 = vmul.f32 %v792_v0, %v2095_v13  ;;  %v826_v44 = vmul.f32 %v794_v49, %v2100_v52  ;;  %v1000_v38 = vadd.f32 1.0, %v1454_v63  ;;  %v798_v61 = vmul.f32 %v2126_v25, %v2126_v25 }
 0x1a0   : > { %v2121_v16 = vadd.f32 %v762_v7, %v1955_v21  ;;  %1121 = vmatpush.bf16.msrb.mxu2 %v1091_v59  ;;  %v944_v4 = vmul.f32 0.7978846, %v912_v26  ;;  %v1456_v37 = vpop.eup %1455  ;;  %v917_v5 = vmul.f32 0.7978846, %v885_v8  ;;  %v919_v48 = vmul.f32 0.7978846, %v887_v1 }
 0x1a1   : > { %v1458_v39 = vpop.eup %1457  ;;  %v1006_v3 = vadd.f32 1.0, %v1456_v37  ;;  %v796_v45 = vmul.f32 %v2132_v30, %v2132_v30  ;;  %v1030_v26 = vmul.f32 0.5, %v998_v10  ;;  %v913_v0 = vmul.f32 0.7978846, %v881_v47 }
 0x1a2   : > { %1461 = vtanh.f32 %v944_v4  ;;  %v800_v62 = vmul.f32 %v2121_v16, %v2121_v16  ;;  %v1460_v23 = vpop.eup %1459  ;;  %v1002_v28 = vadd.f32 1.0, %v1458_v39  ;;  %v856_v49 = vmul.f32 0.044715, %v824_v54 }
 0x1a3   : > { %1463 = vtanh.f32 %v918_v20  ;;  %v1004_v42 = vadd.f32 1.0, %v1460_v23  ;;  %v1032_v8 = vmul.f32 0.5, %v1000_v38  ;;  %v858_v4 = vmul.f32 0.044715, %v826_v44 }
 0x1a4   : > { %1122 = vmatpush.bf16.msrb.mxu2 %v1089_v53  ;;  %v832_v12 = vmul.f32 %v800_v62, %v2121_v16  ;;  %1465 = vtanh.f32 %v917_v5  ;;  %v830_v63 = vmul.f32 %v798_v61, %v2126_v25  ;;  %v1038_v37 = vmul.f32 0.5, %v1006_v3 }
 0x1a5   : > { %1467 = vtanh.f32 %v919_v48  ;;  %v828_v10 = vmul.f32 %v796_v45, %v2132_v30  ;;  %v1034_v20 = vmul.f32 0.5, %v1002_v28  ;;  %v2156_v39 = vmul.f32 %v1030_v26, %v1989_v60 }
 0x1a6   : > { %v716_v24 = vpop.f32.mrf.mxu0  ;;  %v2160_v47 = vadd.f32 %v2023_v40, %v2018_v34  ;;  %v864_v62 = vmul.f32 0.044715, %v832_v12  ;;  %v1036_v54 = vmul.f32 0.5, %v1004_v42  ;;  %v888_v38 = vadd.f32 %v856_v49, %v2095_v13 }
 0x1a7   : > { %v765_v59 = vpop.f32.mrf.mxu1  ;;  %v2167_v61 = vadd.f32 %v2060_v29, %v1957_v22  ;;  %v1064_v60 = vmul.f32 %v1032_v8, %v2007_v51  ;;  %v890_v48 = vadd.f32 %v858_v4, %v2100_v52  ;;  %v862_v34 = vmul.f32 0.044715, %v830_v63 }
 0x1a8   : > { %v1462_v7 = vpop.eup %1461  ;;  %v2149_v35 = vadd.f32 %v765_v59, %v1949_v18  ;;  %v1070_v40 = vmul.f32 %v1038_v37, %v2058_v6  ;;  %v860_v26 = vmul.f32 0.044715, %v828_v10  ;;  %v1066_v42 = vmul.f32 %v1034_v20, %v2013_v27 }
 0x1a9   : > { %v1008_v1 = vadd.f32 1.0, %v1462_v7  ;;  %v2162_v44 = vpop.eup %1463  ;;  %v896_v29 = vadd.f32 %v864_v62, %v2121_v16  ;;  %v1068_v8 = vmul.f32 %v1036_v54, %v2021_v36  ;;  %v2181_v6 = vadd.f32 %v716_v24, %v1949_v18 }
 0x1aa   : > { %v802_v53 = vmul.f32 %v2149_v35, %v2149_v35  ;;  %v1466_v5 = vpop.eup %1465  ;;  %1469 = vtanh.f32 %v913_v0  ;;  %v894_v27 = vadd.f32 %v862_v34, %v2126_v25  ;;  %v2190_v63 = vadd.f32 %v2106_v11, %v1955_v21 }
 0x1ab   : > { %v1040_v23 = vmul.f32 0.5, %v1008_v1  ;;  %v1468_v28 = vpop.eup %1467  ;;  %v981_v22 = vadd.f32 1.0, %v1466_v5  ;;  %v892_v0 = vadd.f32 %v860_v26, %v2132_v30  ;;  %v1090_v10 = vpack.c.bf16 %v1068_v8, %v1066_v42 }
 0x1ac   : > { %v834_v3 = vmul.f32 %v802_v53, %v2149_v35  ;;  %v983_v1 = vadd.f32 1.0, %v1468_v28  ;;  %v928_v53 = vmul.f32 0.7978846, %v896_v29  ;;  %v2200_v21 = vadd.f32 %v2089_v17, %v1951_v19 }
 0x1ad   : > { %v1072_v45 = vmul.f32 %v1040_v23, %v2087_v31  ;;  %v1013_v37 = vmul.f32 0.5, %v981_v22  ;;  %v801_v11 = vmul.f32 %v2181_v6, %v2181_v6  ;;  %v1088_v23 = vpack.c.bf16 %v1064_v60, %v2156_v39 }
 0x1ae   : > { %v866_v12 = vmul.f32 0.044715, %v834_v3  ;;  %v718_v59 = vpop.f32.mrf.mxu0  ;;  %v1015_v20 = vmul.f32 0.5, %v983_v1  ;;  %v926_v54 = vmul.f32 0.7978846, %v894_v27  ;;  %v799_v19 = vmul.f32 %v2190_v63, %v2190_v63 }
 0x1af   : > { %v2177_v7 = vadd.f32 %v718_v59, %v1985_v43  ;;  %v767_v51 = vpop.f32.mrf.mxu1  ;;  %v1092_v49 = vpack.c.bf16 %v1072_v45, %v1070_v40  ;;  %v924_v60 = vmul.f32 0.7978846, %v892_v0  ;;  %v833_v45 = vmul.f32 %v801_v11, %v2181_v6 }
 0x1b0   : > { %v898_v31 = vadd.f32 %v866_v12, %v2149_v35  ;;  %v2185_v4 = vadd.f32 %v767_v51, %v1985_v43  ;;  %v915_v43 = vmul.f32 0.7978846, %v2139_v46  ;;  %v2207_v46 = vmul.f32 %v1013_v37, %v2034_v2  ;;  %v1470_v5 = vpop.eup %1469 }
 0x1b1   : > { %1140 = vmatpush.bf16.msrb.mxu3 %v1092_v49  ;;  %v803_v36 = vmul.f32 %v2177_v7, %v2177_v7  ;;  %v2210_v3 = vmul.f32 %v1015_v20, %v2073_v15  ;;  %v797_v15 = vmul.f32 %v2200_v21, %v2200_v21  ;;  %v920_v26 = vmul.f32 0.7978846, %v888_v38 }
 0x1b2   : > { %v804_v18 = vmul.f32 %v2185_v4, %v2185_v4  ;;  %v930_v24 = vmul.f32 0.7978846, %v898_v31  ;;  %v977_v59 = vadd.f32 1.0, %v1470_v5  ;;  %v795_v42 = vmul.f32 %v2167_v61, %v2167_v61 }
 0x1b3   : > { %v835_v17 = vmul.f32 %v803_v36, %v2177_v7  ;;  %v1079_v2 = vpack.c.bf16 %v2210_v3, %v2207_v46  ;;  %v831_v22 = vmul.f32 %v799_v19, %v2190_v63  ;;  %v793_v38 = vmul.f32 %v2160_v47, %v2160_v47 }
 0x1b4   : > { %v836_v62 = vmul.f32 %v804_v18, %v2185_v4  ;;  %1471 = vtanh.f32 %v930_v24  ;;  %v829_v27 = vmul.f32 %v797_v15, %v2200_v21  ;;  %v865_v1 = vmul.f32 0.044715, %v833_v45 }
 0x1b5   : > { %1141 = vmatpush.bf16.msrb.mxu3 %v1090_v10  ;;  %1473 = vtanh.f32 %v915_v43  ;;  %v867_v29 = vmul.f32 0.044715, %v835_v17  ;;  %v1009_v18 = vmul.f32 0.5, %v977_v59  ;;  %v827_v24 = vmul.f32 %v795_v42, %v2167_v61 }
 0x1b6   : > { %v868_v34 = vmul.f32 0.044715, %v836_v62  ;;  %v721_v40 = vpop.f32.mrf.mxu0  ;;  %1475 = vtanh.f32 %v928_v53  ;;  %v863_v43 = vmul.f32 0.044715, %v831_v22  ;;  %v861_v5 = vmul.f32 0.044715, %v829_v27 }
 0x1b7   : > { %v2216_v39 = vadd.f32 %v721_v40, %v1947_v14  ;;  %1477 = vtanh.f32 %v926_v54  ;;  %v922_v14 = vmul.f32 0.7978846, %v890_v48  ;;  %v899_v0 = vadd.f32 %v867_v29, %v2177_v7 }
 0x1b8   : > { %v900_v28 = vadd.f32 %v868_v34, %v2185_v4  ;;  %1479 = vtanh.f32 %v924_v60  ;;  %v825_v54 = vmul.f32 %v793_v38, %v2160_v47  ;;  %v897_v19 = vadd.f32 %v865_v1, %v2181_v6 }
 0x1b9   : > { %v805_v12 = vmul.f32 %v2216_v39, %v2216_v39  ;;  %1142 = vmatpush.bf16.msrb.mxu3 %v1088_v23  ;;  %v2244_v15 = vmul.f32 %v1009_v18, %v2025_v41 }
 0x1ba   : > { %v932_v51 = vmul.f32 0.7978846, %v900_v28  ;;  %v1472_v49 = vpop.eup %1471  ;;  %v859_v28 = vmul.f32 0.044715, %v827_v24  ;;  %v857_v41 = vmul.f32 0.044715, %v825_v54 }
 0x1bb   : > { %v837_v8 = vmul.f32 %v805_v12, %v2216_v39  ;;  %v1474_v31 = vpop.eup %1473  ;;  %v994_v62 = vadd.f32 1.0, %v1472_v49 }
 0x1bc   : > { %1481 = vtanh.f32 %v932_v51  ;;  %v1476_v48 = vpop.eup %1475  ;;  %v979_v36 = vadd.f32 1.0, %v1474_v31  ;;  %v929_v31 = vmul.f32 0.7978846, %v897_v19  ;;  %v982_v19 = vadd.f32 1.0, %v2162_v44 }
 0x1bd   : > { %v869_v37 = vmul.f32 0.044715, %v837_v8  ;;  %1483 = vtanh.f32 %v922_v14  ;;  %v1478_v53 = vpop.eup %1477  ;;  %v992_v17 = vadd.f32 1.0, %v1476_v48  ;;  %v931_v14 = vmul.f32 0.7978846, %v899_v0 }
 0x1be   : > { %v723_v10 = vpop.f32.mrf.mxu0  ;;  %1485 = vtanh.f32 %v920_v26  ;;  %v1011_v23 = vmul.f32 0.5, %v979_v36  ;;  %v1480_v34 = vpop.eup %1479  ;;  %v895_v26 = vadd.f32 %v863_v43, %v2190_v63  ;;  %v990_v12 = vadd.f32 1.0, %v1478_v53 }
 0x1bf   : > { %v901_v20 = vadd.f32 %v869_v37, %v2216_v39  ;;  %v2237_v11 = vadd.f32 %v723_v10, %v1963_v32  ;;  %v1026_v29 = vmul.f32 0.5, %v994_v62  ;;  %v893_v8 = vadd.f32 %v861_v5, %v2200_v21 }
 0x1c0   : > { %v2247_v45 = vmul.f32 %v1011_v23, %v2047_v57  ;;  %v988_v57 = vadd.f32 1.0, %v1480_v34  ;;  %v1024_v1 = vmul.f32 0.5, %v992_v17  ;;  %v891_v48 = vadd.f32 %v859_v28, %v2167_v61 }
 0x1c1   : > { %v807_v40 = vmul.f32 %v2237_v11, %v2237_v11  ;;  %v933_v60 = vmul.f32 0.7978846, %v901_v20  ;;  %v1022_v37 = vmul.f32 0.5, %v990_v12  ;;  %v927_v18 = vmul.f32 0.7978846, %v895_v26 }
 0x1c2   : > { %v1482_v32 = vpop.eup %1481  ;;  %v1077_v51 = vpack.c.bf16 %v2247_v45, %v2244_v15  ;;  %v1058_v43 = vmul.f32 %v1026_v29, %v2149_v35  ;;  %v889_v10 = vadd.f32 %v857_v41, %v2160_v47  ;;  %v1020_v53 = vmul.f32 0.5, %v988_v57 }
 0x1c3   : > { %v1484_v59 = vpop.eup %1483  ;;  %v839_v42 = vmul.f32 %v807_v40, %v2237_v11  ;;  %v996_v22 = vadd.f32 1.0, %v1482_v32  ;;  %1487 = vtanh.f32 %v933_v60  ;;  %v925_v62 = vmul.f32 0.7978846, %v893_v8 }
 0x1c4   : > { %v1486_v49 = vpop.eup %1485  ;;  %v986_v36 = vadd.f32 1.0, %v1484_v59  ;;  %1489 = vtanh.f32 %v931_v14  ;;  %v1056_v54 = vmul.f32 %v1024_v1, %v2121_v16  ;;  %v1054_v35 = vmul.f32 %v1022_v37, %v2126_v25 }
 0x1c5   : > { %v871_v38 = vmul.f32 0.044715, %v839_v42  ;;  %v1028_v27 = vmul.f32 0.5, %v996_v22  ;;  %v984_v20 = vadd.f32 1.0, %v1486_v49  ;;  %1491 = vtanh.f32 %v929_v31 }
 0x1c6   : > { %1493 = vtanh.f32 %v927_v18  ;;  %v1018_v34 = vmul.f32 0.5, %v986_v36  ;;  %v1084_v32 = vpack.c.bf16 %v1056_v54, %v1054_v35  ;;  %v1052_v28 = vmul.f32 %v1020_v53, %v2132_v30 }
 0x1c7   : > { %v903_v24 = vadd.f32 %v871_v38, %v2237_v11  ;;  %v1060_v0 = vmul.f32 %v1028_v27, %v2185_v4  ;;  %v923_v4 = vmul.f32 0.7978846, %v891_v48  ;;  %v1016_v40 = vmul.f32 0.5, %v984_v20 }
 0x1c8   : > { %v921_v26 = vmul.f32 0.7978846, %v889_v10  ;;  %v1050_v44 = vmul.f32 %v1018_v34, %v2100_v52  ;;  %v1014_v14 = vmul.f32 0.5, %v982_v19  ;;  %v1590_v30 = vmov 2   ;;  %v1503_v52 = vld [vmem:[%s2362_s1 + $0x8] sm:$0xff] }
 0x1c9   : > { %v1086_v23 = vpack.c.bf16 %v1060_v0, %v1058_v43  ;;  %v935_v5 = vmul.f32 0.7978846, %v903_v24  ;;  %v1488_v17 = vpop.eup %1487  ;;  %v1048_v29 = vmul.f32 %v1016_v40, %v2095_v13  ;;  %1427 = vset.pattern.permute.xlu0 %v1590_v30  ;;  %1428 = vset.pattern.permute.xlu1 %v1590_v30  ;;  %v1504_v13 = vld [vmem:[%s2362_s1 + $0x10] sm:$0xff] }
 0x1ca   : > { %v1490_v60 = vpop.eup %1489  ;;  %v997_v16 = vadd.f32 1.0, %v1488_v17  ;;  %v1082_v22 = vpack.c.bf16 %v1052_v28, %v1050_v44  ;;  %v1046_v31 = vmul.f32 %v1014_v14, %v2050_v56  ;;  %1098 = vperm.xlu0 %1427, %v1503_v52   ;;  %1102 = vperm.xlu1 %1428, %v1504_v13   ;;  %v1505_v56 = vld [vmem:[%s2362_s1] sm:$0xff]  ;;  %v2383_v14 = vld [vmem:[#allocation10_spill] sm:$0xff] }
 0x1cb   : > { %1143 = vmatpush.bf16.msrb.mxu3 %v1086_v23  ;;  %1495 = vtanh.f32 %v935_v5  ;;  %v1492_v12 = vpop.eup %1491  ;;  %v995_v42 = vadd.f32 1.0, %v1490_v60  ;;  %1426 = vset.pattern.permute.xlu2 %v1590_v30  ;;  %v1350_v23 = vld [vmem:[%s2365_s4] sm:$0xff]  ;;  %v2381_v60 = vld [vmem:[#allocation8_spill] sm:$0xff] }
 0x1cc   : > { %1497 = vtanh.f32 %v925_v62  ;;  %v1494_v59 = vpop.eup %1493  ;;  %v1029_v41 = vmul.f32 0.5, %v997_v16  ;;  %v993_v8 = vadd.f32 1.0, %v1492_v12  ;;  %v1080_v37 = vpack.c.bf16 %v1048_v29, %v1046_v31  ;;  %1094 = vperm.xlu2 %1426, %v1505_v56   ;;  %v2386_v52 = vld [vmem:[#allocation9_spill] sm:$0xff] }
 0x1cd   : > { %1499 = vtanh.f32 %v923_v4  ;;  %v1027_v27 = vmul.f32 0.5, %v995_v42  ;;  %v991_v1 = vadd.f32 1.0, %v1494_v59 }
 0x1ce   : > { %1501 = vtanh.f32 %v921_v26  ;;  %v1061_v36 = vmul.f32 %v1029_v41, %v2216_v39  ;;  %v1025_v24 = vmul.f32 0.5, %v993_v8  ;;  %v2382_v26 = vld [vmem:[#allocation6_spill] sm:$0xff]  ;;  %v2385_v8 = vld [vmem:[#allocation7_spill] sm:$0xff] }
 0x1cf   : > { %1144 = vmatpush.bf16.msrb.mxu3 %v1084_v32  ;;  %v1059_v53 = vmul.f32 %v1027_v27, %v2177_v7  ;;  %v1023_v20 = vmul.f32 0.5, %v991_v1  ;;  %v1506_v7 = vld [vmem:[%s2362_s1 + $0x18] sm:$0xff] }
 0x1d0   : > { %v1057_v54 = vmul.f32 %v1025_v24, %v2181_v6 }
 0x1d1   : > { %v1496_v25 = vpop.eup %1495  ;;  %v1055_v19 = vmul.f32 %v1023_v20, %v2190_v63  ;;  %v1351_v63 = vld [vmem:[%s2365_s4 + $0x8] sm:$0xff] }
 0x1d2   : > { %v999_v49 = vadd.f32 1.0, %v1496_v25  ;;  %v1498_v57 = vpop.eup %1497 }
 0x1d3   : > { %1145 = vmatpush.bf16.msrb.mxu3 %v1082_v22  ;;  %v1500_v48 = vpop.eup %1499  ;;  %v989_v43 = vadd.f32 1.0, %v1498_v57  ;;  %v2384_v22 = vld [vmem:[#allocation5_spill] sm:$0xff] }
 0x1d4   : > { %v1031_v38 = vmul.f32 0.5, %v999_v49  ;;  %v1502_v0 = vpop.eup %1501  ;;  %v987_v62 = vadd.f32 1.0, %v1500_v48  ;;  %1106 = vperm.xlu2 %1426, %v1506_v7  }
 0x1d5   : > { %v1021_v5 = vmul.f32 0.5, %v989_v43  ;;  %v985_v39 = vadd.f32 1.0, %v1502_v0 }
 0x1d6   : > { %v1063_v18 = vmul.f32 %v1031_v38, %v2237_v11  ;;  %v1085_v11 = vpack.c.bf16 %v1059_v53, %v1057_v54  ;;  %v1019_v17 = vmul.f32 0.5, %v987_v62 }
 0x1d7   : > { %1146 = vmatpush.bf16.msrb.mxu3 %v1080_v37  ;;  %v1053_v6 = vmul.f32 %v1021_v5, %v2200_v21  ;;  %v1017_v35 = vmul.f32 0.5, %v985_v39 }
 0x1d8   : > { %v1087_v10 = vpack.c.bf16 %v1063_v18, %v1061_v36  ;;  %v1051_v9 = vmul.f32 %v1019_v17, %v2167_v61 }
 0x1d9   : > { %v1083_v34 = vpack.c.bf16 %v1055_v19, %v1053_v6  ;;  %v1049_v55 = vmul.f32 %v1017_v35, %v2160_v47 }
 0x1da   : > { %1123 = vmatpush.bf16.msrb.mxu2 %v1087_v10 }
 0x1db   : > { %1147 = vmatpush.bf16.msrb.mxu3 %v1078_v33  ;;  %v1081_v33 = vpack.c.bf16 %v1051_v9, %v1049_v55 }
 0x1de   : > { %1148 = vmatmul.bf16.vlgmr.msrb.gmra.mxu3 %v1350_v23  ;;  %1124 = vmatpush.bf16.msrb.mxu2 %v1085_v11 }
 0x1e2   : > { %1125 = vmatpush.bf16.msrb.mxu2 %v1083_v34 }
 0x1e6   : > { %1126 = vmatpush.bf16.msrb.mxu2 %v1081_v33 }
 0x1ea   : > { %1127 = vmatpush.bf16.msrb.mxu2 %v1079_v2 }
 0x1ee   : > { %1153 = vmatmul.bf16.gmra.mxu3 %v1351_v63  ;;  %1128 = vmatpush.bf16.msrb.mxu2 %v1077_v51 }
 0x1f1   : > { %1129 = vmatmul.bf16.vlgmr.msrb.gmra.mxu2 %v1350_v23 }
 0x201   : > { %1134 = vmatmul.bf16.gmra.mxu2 %v1351_v63 }
 0x226   : > { %v1095_v61 = vpop.permute.xlu2 %1094 }
 0x22e   : > { %v1107_v12 = vpop.permute.xlu2 %1106 }
 0x23c   : > { %v1099_v3 = vpop.permute.xlu0 %1098  ;;  %v1103_v51 = vpop.permute.xlu1 %1102 }
 0x261   : > { %v1149_v47 = vpop.f32.mrf.mxu3 }
 0x262   : > { %v1150_v21 = vadd.f32 %v1149_v47, %v1095_v61 }
 0x264   : > { %v1160_v46 = vadd.f32 %v1150_v21, %v1810_v50 }
 0x266   : > { %1168 = vst [vmem:[%s2305_s7 + $0x8] sm:$0xff] %v1160_v46 }
 0x269   : > { %v1151_v2 = vpop.f32.mrf.mxu3 }
 0x26a   : > { %v1152_v15 = vadd.f32 %v1151_v2, %v1099_v3 }
 0x26c   : > { %v1162_v45 = vadd.f32 %v1152_v15, %v1804_v58 }
 0x26e   : > { %1170 = vst [vmem:[%s2305_s7 + $0x18] sm:$0xff] %v1162_v45 }
 0x271   : > { %v1154_v4 = vpop.f32.mrf.mxu3 }
 0x272   : > { %v1155_v40 = vadd.f32 %v1154_v4, %v1103_v51 }
 0x274   : > { %v1164_v50 = vadd.f32 %v1155_v40, %v2381_v60  ;;  %v1130_v32 = vpop.f32.mrf.mxu2 }
 0x275   : > { %v1131_v28 = vadd.f32 %v1130_v32, %v1095_v61 }
 0x276   : > { %1172 = vst [vmem:[%s2305_s7 + $0x28] sm:$0xff] %v1164_v50 }
 0x277   : > { %v1159_v16 = vadd.f32 %v1131_v28, %v2382_v26 }
 0x279   : > { %1167 = vst [vmem:[%s2305_s7] sm:$0xff] %v1159_v16  ;;  %v1156_v44 = vpop.f32.mrf.mxu3 }
 0x27a   : > { %v1157_v58 = vadd.f32 %v1156_v44, %v1107_v12 }
 0x27c   : > { %v1166_v59 = vadd.f32 %v1157_v58, %v2383_v14  ;;  %v1132_v42 = vpop.f32.mrf.mxu2 }
 0x27d   : > { %v1133_v25 = vadd.f32 %v1132_v42, %v1099_v3 }
 0x27e   : > { %1174 = vst [vmem:[%s2305_s7 + $0x38] sm:$0xff] %v1166_v59 }
 0x27f   : > { %v1161_v29 = vadd.f32 %v1133_v25, %v2384_v22 }
 0x281   : > { %1169 = vst [vmem:[%s2305_s7 + $0x10] sm:$0xff] %v1161_v29 }
 0x284   : > { %v1135_v49 = vpop.f32.mrf.mxu2 }
 0x285   : > { %v1136_v41 = vadd.f32 %v1135_v49, %v1103_v51 }
 0x287   : > { %v1163_v30 = vadd.f32 %v1136_v41, %v2385_v8 }
 0x289   : > { %1171 = vst [vmem:[%s2305_s7 + $0x20] sm:$0xff] %v1163_v30 }
 0x28c   : > { %v1137_v57 = vpop.f32.mrf.mxu2 }
 0x28d   : > { %v1138_v31 = vadd.f32 %v1137_v57, %v1107_v12 }
 0x28f   : > { %v1165_v38 = vadd.f32 %v1138_v31, %v2386_v52 }
 0x291   : > { %1173 = vst [vmem:[%s2305_s7 + $0x30] sm:$0xff] %v1165_v38 }
 0x292   : > { %1534 = shalt.err (!%p1531_p5)
}
 0x293   : > { %s1591_s27 = smov 256   ;;  %s1592_s7 = smov 16  }
 0x294   : > { %1357 = dma.vmem_to_hbm [thread:$0]  (%p1663_p4), %s1191_s12, 1024, %s1193_s13, %s1176_s14, %s1591_s27, %s1591_s27, %s1592_s7  }
 0x295 PF: > { %p1363_p6 = scmp.ge.s32.totalorder %s1585_s23, 2  ;;  %s1207_s8 = sand.u32 1, %s1565_s18  }
 0x296   : > { %s1208_s9 = scalar_lea.sflag [#allocation3], %s1207_s8 }
 0x297   : > { %p1360_p7 = pnand %p1363_p6, %p1670_p8 }
 0x299   : > { %p1361_p9 = pneg %p1360_p7 }
 0x29b   : > { %1560 = dma.done.wait (%p1361_p9), %s1208_s9, 1024  }
 0x29c   : > { %1562 = vsyncadd (%p1361_p9), %s1208_s9, 4294966272  ;;  %s18_s23 = sadd.s32 1, %s1585_s23   ;;  %s2387_s18 = smov %s1569_s19 }
 0x29d   : > { %p15_p10 = scmp.ge.s32.totalorder %s18_s23, 4   ;;  %s2388_s19 = smov %s1573_s20 }
 0x29e   : > { %s2389_s20 = smov %s1676_s6  ;;  %s2390_s21 = smov %s1581_s22 }
 0x29f   : > { %s2391_s22 = smov %s2393_s26  ;;  %17 = sbr.rel (!%p15_p10) target bundleno = 4 (0x4), region = 75 }
 0x2a4   :  { %1214 = vsyncpa [#allocation3], 1 }
 0x2a5   :  { %1216 = vsyncpa [#allocation3 + $0x1], 1 }

</bundles_post_ra>
